<compile_context>
chip_gen: v6e
topology: v6e:2x2x1
jax: 0.10.0
libtpu: 0.0.40
codegen_flags: <defaults>
</compile_context>

<pallas_src>
import jax
import jax.numpy as jnp
import numpy as np
from jax import lax
from jax.experimental import pallas as pl
from jax.experimental.pallas import tpu as pltpu


def _rnn_kernel(xproj_ref, whh_ref, wl_ref, bl_ref, o_ref):
    """Single invocation: full recurrence + last-step classifier.

    xproj_ref: (T, B_pad, dh_pad)  pre-projected inputs  emb[tok] @ W_ih + b
    whh_ref:   (dh_pad, dh_pad)    hidden->hidden weight (transposed, padded)
    wl_ref:    (dh_pad, out_pad)   classifier weight (transposed, padded)
    bl_ref:    (1, out_pad)        classifier bias (padded)
    o_ref:     (B_pad, out_pad)    output logits (lane-dense, sliced by caller)
    """
    T = xproj_ref.shape[0]
    b_pad = xproj_ref.shape[1]
    dh_pad = xproj_ref.shape[2]

    # Hoist weight load out of the serial loop (JAX does not CSE this).
    whh = whh_ref[...]                                   # (dh_pad, dh_pad)

    def step(t, h):
        x_t = xproj_ref[t]                               # (B_pad, dh_pad)
        return jnp.tanh(
            x_t + jnp.dot(h, whh, preferred_element_type=jnp.float32)
        )

    h0 = jnp.zeros((b_pad, dh_pad), jnp.float32)
    # T is small and static -> fully unroll so the LLO scheduler sees the
    # whole chain; h stays in vregs across steps.
    h = lax.fori_loop(0, T, step, h0, unroll=True)

    logits = (
        jnp.dot(h, wl_ref[...], preferred_element_type=jnp.float32)
        + bl_ref[...]
    )
    o_ref[...] = logits.astype(o_ref.dtype)


def _round_up(x, m):
    return ((x + m - 1) // m) * m


def rnn_forward(x_tokens, params):
    """x_tokens: int32 (B, T) token ids.  Returns (B, 4) float32 logits."""
    emb, w_ih, w_hh, b, w_lin, b_lin = (
        params["emb"], params["w_ih"], params["w_hh"],
        params["b"], params["w_lin"], params["b_lin"],
    )
    B, T = x_tokens.shape
    dh = w_hh.shape[0]
    n_out = w_lin.shape[1]

    dh_pad = _round_up(dh, 128)       # lane-dense recurrent tiles
    out_pad = _round_up(n_out, 128)   # lane-dense output store
    b_pad = _round_up(B, 8)           # sublane-aligned batch

    # --- Hoist the input projection out of the recurrence -----------------
    # Gather commutes with a linear map: pre-project the embedding table once
    # and fold the combined RNN bias in.  PAD row of `emb` is zero, so the
    # projected PAD row is exactly `b`, preserving padding_idx semantics.
    emb_proj = emb @ w_ih + b                                  # (n_vocab, dh)
    emb_proj = jnp.pad(emb_proj, ((0, 0), (0, dh_pad - dh)))   # (n_vocab, dh_pad)

    # Time-major gather directly (no separate transpose of the slab).
    x_proj = jnp.take(emb_proj, x_tokens.T, axis=0)            # (T, B, dh_pad)
    x_proj = jnp.pad(x_proj, ((0, 0), (0, b_pad - B), (0, 0))) # (T, B_pad, dh_pad)

    # Zero-pad weights so padded hidden units stay identically zero.
    whh_p = jnp.pad(w_hh, ((0, dh_pad - dh), (0, dh_pad - dh)))
    wl_p = jnp.pad(w_lin, ((0, dh_pad - dh), (0, out_pad - n_out)))
    bl_p = jnp.pad(b_lin, ((0, 0), (0, out_pad - n_out)))

    out = pl.pallas_call(
        _rnn_kernel,
        out_shape=jax.ShapeDtypeStruct((b_pad, out_pad), jnp.float32),
        grid_spec=pltpu.PrefetchScalarGridSpec(
            num_scalar_prefetch=0,
            grid=(1,),                # single step: whole recurrence in-kernel
            in_specs=[
                pl.BlockSpec((T, b_pad, dh_pad), lambda i: (0, 0, 0)),  # x_proj
                pl.BlockSpec((dh_pad, dh_pad), lambda i: (0, 0)),       # W_hh^T
                pl.BlockSpec((dh_pad, out_pad), lambda i: (0, 0)),      # W_lin^T
                pl.BlockSpec((1, out_pad), lambda i: (0, 0)),           # b_lin
            ],
            out_specs=pl.BlockSpec((b_pad, out_pad), lambda i: (0, 0)),
        ),
        compiler_params=pltpu.CompilerParams(
            dimension_semantics=("arbitrary",),
        ),
    )(x_proj, whh_p, wl_p, bl_p)

    return out[:B, :n_out]


def rnn_reference(x_tokens, params):
    """Pure-JAX reference of the same forward pass."""
    emb, w_ih, w_hh, b, w_lin, b_lin = (
        params["emb"], params["w_ih"], params["w_hh"],
        params["b"], params["w_lin"], params["b_lin"],
    )
    x_emb = jnp.take(emb, x_tokens, axis=0)            # (B, T, dw)
    B, T, _ = x_emb.shape
    h = jnp.zeros((B, w_hh.shape[0]), jnp.float32)
    for t in range(T):
        h = jnp.tanh(x_emb[:, t, :] @ w_ih + h @ w_hh + b)
    return h @ w_lin + b_lin


def init_params(key, n_vocab, dw, dh, pad_idx):
    k_emb, k_ih, k_hh, k_bih, k_bhh, k_wl, k_bl = jax.random.split(key, 7)
    emb = 0.1 * jax.random.normal(k_emb, (n_vocab, dw), jnp.float32)
    emb = emb.at[pad_idx].set(0.0)                     # padding_idx behavior
    s_rnn = 1.0 / np.sqrt(dh)
    w_ih = jax.random.uniform(k_ih, (dw, dh), jnp.float32, -s_rnn, s_rnn)
    w_hh = jax.random.uniform(k_hh, (dh, dh), jnp.float32, -s_rnn, s_rnn)
    b_ih = jax.random.uniform(k_bih, (dh,), jnp.float32, -s_rnn, s_rnn)
    b_hh = jax.random.uniform(k_bhh, (dh,), jnp.float32, -s_rnn, s_rnn)
    b = (b_ih + b_hh).reshape(1, dh)
    s_lin = 1.0 / np.sqrt(dh)
    w_lin = jax.random.uniform(k_wl, (dh, 4), jnp.float32, -s_lin, s_lin)
    b_lin = jax.random.uniform(k_bl, (1, 4), jnp.float32, -s_lin, s_lin)
    return {"emb": emb, "w_ih": w_ih, "w_hh": w_hh, "b": b,
            "w_lin": w_lin, "b_lin": b_lin}


if __name__ == "__main__":
    # Small shapes consistent with the module (dw=300, dh=50 in the original;
    # scaled down here): vocab=40 (PAD = vocab-1), dw=64, dh=32, B=2, T=8.
    B, T, dw, dh, n_vocab = 2, 8, 64, 32, 40
    PAD = n_vocab - 1

    key = jax.random.PRNGKey(0)
    k_params, k_tok = jax.random.split(key)
    params = init_params(k_params, n_vocab, dw, dh, PAD)

    x_tokens = jax.random.randint(k_tok, (B, T), 0, n_vocab - 2, jnp.int32)
    # Put a couple of PAD tokens at the end of one row, like a padded batch.
    x_tokens = x_tokens.at[1, -2:].set(PAD)

    out = rnn_forward(x_tokens, params)
    out = jax.block_until_ready(out)

    ref = jax.block_until_ready(rnn_reference(x_tokens, params))
    np.testing.assert_allclose(np.asarray(out), np.asarray(ref),
                               rtol=2e-2, atol=2e-2)

    assert out.shape == (B, 4) and out.dtype == jnp.float32
    print("KERNEL_OK")
</pallas_src>

<mosaic_0001>
module attributes {stable_mosaic.version = 11 : i64} {
  func.func @_rnn_kernel(%arg0: i32, %arg1: memref<8x8x128xf32, #tpu.memory_space<vmem>>, %arg2: memref<128x128xf32, #tpu.memory_space<vmem>>, %arg3: memref<128x128xf32, #tpu.memory_space<vmem>>, %arg4: memref<1x128xf32, #tpu.memory_space<vmem>>, %arg5: memref<8x128xf32, #tpu.memory_space<vmem>>) attributes {dimension_semantics = [#tpu.dimension_semantics<arbitrary>], iteration_bounds = array<i64: 1>, scalar_prefetch = 0 : i64, scratch_operands = 0 : i64, tpu.core_type = #tpu.core_type<tc>, window_params = [{pipeline_mode = #tpu.pipeline_mode<synchronous>, transform_indices = @transform_0, window_bounds = array<i64: 8, 8, 128>}, {pipeline_mode = #tpu.pipeline_mode<synchronous>, transform_indices = @transform_1, window_bounds = array<i64: 128, 128>}, {pipeline_mode = #tpu.pipeline_mode<synchronous>, transform_indices = @transform_2, window_bounds = array<i64: 128, 128>}, {pipeline_mode = #tpu.pipeline_mode<synchronous>, transform_indices = @transform_3, window_bounds = array<i64: 1, 128>}, {pipeline_mode = #tpu.pipeline_mode<synchronous>, transform_indices = @transform_4, window_bounds = array<i64: 8, 128>}]} {
    %c0 = arith.constant 0 : index
    %c0_0 = arith.constant 0 : index
    %0 = vector.load %arg2[%c0, %c0_0] : memref<128x128xf32, #tpu.memory_space<vmem>>, vector<128x128xf32>
    %cst = arith.constant 0.000000e+00 : f32
    %1 = vector.broadcast %cst : f32 to vector<8x128xf32>
    %c0_i32 = arith.constant 0 : i32
    %2 = arith.index_cast %c0_i32 : i32 to index
    %c0_1 = arith.constant 0 : index
    %c0_2 = arith.constant 0 : index
    %3 = vector.load %arg1[%2, %c0_1, %c0_2] : memref<8x8x128xf32, #tpu.memory_space<vmem>>, vector<1x8x128xf32>
    %4 = vector.shape_cast %3 : vector<1x8x128xf32> to vector<8x128xf32>
    %cst_3 = arith.constant dense<0.000000e+00> : vector<8x128xf32>
    %5 = tpu.matmul %1, %0, %cst_3 {dimension_numbers = #tpu.dot_dimension_numbers<[1], [0], [0], [1], [0, 0, 1, 1], [], []>} : vector<8x128xf32>, vector<128x128xf32>, vector<8x128xf32> -> vector<8x128xf32>
    %6 = arith.addf %4, %5 : vector<8x128xf32>
    %7 = math.tanh %6 : vector<8x128xf32>
    %c1_i32 = arith.constant 1 : i32
    %8 = arith.index_cast %c1_i32 : i32 to index
    %c0_4 = arith.constant 0 : index
    %c0_5 = arith.constant 0 : index
    %9 = vector.load %arg1[%8, %c0_4, %c0_5] : memref<8x8x128xf32, #tpu.memory_space<vmem>>, vector<1x8x128xf32>
    %10 = vector.shape_cast %9 : vector<1x8x128xf32> to vector<8x128xf32>
    %cst_6 = arith.constant dense<0.000000e+00> : vector<8x128xf32>
    %11 = tpu.matmul %7, %0, %cst_6 {dimension_numbers = #tpu.dot_dimension_numbers<[1], [0], [0], [1], [0, 0, 1, 1], [], []>} : vector<8x128xf32>, vector<128x128xf32>, vector<8x128xf32> -> vector<8x128xf32>
    %12 = arith.addf %10, %11 : vector<8x128xf32>
    %13 = math.tanh %12 : vector<8x128xf32>
    %c2_i32 = arith.constant 2 : i32
    %14 = arith.index_cast %c2_i32 : i32 to index
    %c0_7 = arith.constant 0 : index
    %c0_8 = arith.constant 0 : index
    %15 = vector.load %arg1[%14, %c0_7, %c0_8] : memref<8x8x128xf32, #tpu.memory_space<vmem>>, vector<1x8x128xf32>
    %16 = vector.shape_cast %15 : vector<1x8x128xf32> to vector<8x128xf32>
    %cst_9 = arith.constant dense<0.000000e+00> : vector<8x128xf32>
    %17 = tpu.matmul %13, %0, %cst_9 {dimension_numbers = #tpu.dot_dimension_numbers<[1], [0], [0], [1], [0, 0, 1, 1], [], []>} : vector<8x128xf32>, vector<128x128xf32>, vector<8x128xf32> -> vector<8x128xf32>
    %18 = arith.addf %16, %17 : vector<8x128xf32>
    %19 = math.tanh %18 : vector<8x128xf32>
    %c3_i32 = arith.constant 3 : i32
    %20 = arith.index_cast %c3_i32 : i32 to index
    %c0_10 = arith.constant 0 : index
    %c0_11 = arith.constant 0 : index
    %21 = vector.load %arg1[%20, %c0_10, %c0_11] : memref<8x8x128xf32, #tpu.memory_space<vmem>>, vector<1x8x128xf32>
    %22 = vector.shape_cast %21 : vector<1x8x128xf32> to vector<8x128xf32>
    %cst_12 = arith.constant dense<0.000000e+00> : vector<8x128xf32>
    %23 = tpu.matmul %19, %0, %cst_12 {dimension_numbers = #tpu.dot_dimension_numbers<[1], [0], [0], [1], [0, 0, 1, 1], [], []>} : vector<8x128xf32>, vector<128x128xf32>, vector<8x128xf32> -> vector<8x128xf32>
    %24 = arith.addf %22, %23 : vector<8x128xf32>
    %25 = math.tanh %24 : vector<8x128xf32>
    %c4_i32 = arith.constant 4 : i32
    %26 = arith.index_cast %c4_i32 : i32 to index
    %c0_13 = arith.constant 0 : index
    %c0_14 = arith.constant 0 : index
    %27 = vector.load %arg1[%26, %c0_13, %c0_14] : memref<8x8x128xf32, #tpu.memory_space<vmem>>, vector<1x8x128xf32>
    %28 = vector.shape_cast %27 : vector<1x8x128xf32> to vector<8x128xf32>
    %cst_15 = arith.constant dense<0.000000e+00> : vector<8x128xf32>
    %29 = tpu.matmul %25, %0, %cst_15 {dimension_numbers = #tpu.dot_dimension_numbers<[1], [0], [0], [1], [0, 0, 1, 1], [], []>} : vector<8x128xf32>, vector<128x128xf32>, vector<8x128xf32> -> vector<8x128xf32>
    %30 = arith.addf %28, %29 : vector<8x128xf32>
    %31 = math.tanh %30 : vector<8x128xf32>
    %c5_i32 = arith.constant 5 : i32
    %32 = arith.index_cast %c5_i32 : i32 to index
    %c0_16 = arith.constant 0 : index
    %c0_17 = arith.constant 0 : index
    %33 = vector.load %arg1[%32, %c0_16, %c0_17] : memref<8x8x128xf32, #tpu.memory_space<vmem>>, vector<1x8x128xf32>
    %34 = vector.shape_cast %33 : vector<1x8x128xf32> to vector<8x128xf32>
    %cst_18 = arith.constant dense<0.000000e+00> : vector<8x128xf32>
    %35 = tpu.matmul %31, %0, %cst_18 {dimension_numbers = #tpu.dot_dimension_numbers<[1], [0], [0], [1], [0, 0, 1, 1], [], []>} : vector<8x128xf32>, vector<128x128xf32>, vector<8x128xf32> -> vector<8x128xf32>
    %36 = arith.addf %34, %35 : vector<8x128xf32>
    %37 = math.tanh %36 : vector<8x128xf32>
    %c6_i32 = arith.constant 6 : i32
    %38 = arith.index_cast %c6_i32 : i32 to index
    %c0_19 = arith.constant 0 : index
    %c0_20 = arith.constant 0 : index
    %39 = vector.load %arg1[%38, %c0_19, %c0_20] : memref<8x8x128xf32, #tpu.memory_space<vmem>>, vector<1x8x128xf32>
    %40 = vector.shape_cast %39 : vector<1x8x128xf32> to vector<8x128xf32>
    %cst_21 = arith.constant dense<0.000000e+00> : vector<8x128xf32>
    %41 = tpu.matmul %37, %0, %cst_21 {dimension_numbers = #tpu.dot_dimension_numbers<[1], [0], [0], [1], [0, 0, 1, 1], [], []>} : vector<8x128xf32>, vector<128x128xf32>, vector<8x128xf32> -> vector<8x128xf32>
    %42 = arith.addf %40, %41 : vector<8x128xf32>
    %43 = math.tanh %42 : vector<8x128xf32>
    %c7_i32 = arith.constant 7 : i32
    %44 = arith.index_cast %c7_i32 : i32 to index
    %c0_22 = arith.constant 0 : index
    %c0_23 = arith.constant 0 : index
    %45 = vector.load %arg1[%44, %c0_22, %c0_23] : memref<8x8x128xf32, #tpu.memory_space<vmem>>, vector<1x8x128xf32>
    %46 = vector.shape_cast %45 : vector<1x8x128xf32> to vector<8x128xf32>
    %cst_24 = arith.constant dense<0.000000e+00> : vector<8x128xf32>
    %47 = tpu.matmul %43, %0, %cst_24 {dimension_numbers = #tpu.dot_dimension_numbers<[1], [0], [0], [1], [0, 0, 1, 1], [], []>} : vector<8x128xf32>, vector<128x128xf32>, vector<8x128xf32> -> vector<8x128xf32>
    %48 = arith.addf %46, %47 : vector<8x128xf32>
    %49 = math.tanh %48 : vector<8x128xf32>
    %c8_i32 = arith.constant 8 : i32
    %c0_25 = arith.constant 0 : index
    %c0_26 = arith.constant 0 : index
    %50 = vector.load %arg3[%c0_25, %c0_26] : memref<128x128xf32, #tpu.memory_space<vmem>>, vector<128x128xf32>
    %cst_27 = arith.constant dense<0.000000e+00> : vector<8x128xf32>
    %51 = tpu.matmul %49, %50, %cst_27 {dimension_numbers = #tpu.dot_dimension_numbers<[1], [0], [0], [1], [0, 0, 1, 1], [], []>} : vector<8x128xf32>, vector<128x128xf32>, vector<8x128xf32> -> vector<8x128xf32>
    %c0_28 = arith.constant 0 : index
    %c0_29 = arith.constant 0 : index
    %52 = vector.load %arg4[%c0_28, %c0_29] : memref<1x128xf32, #tpu.memory_space<vmem>>, vector<1x128xf32>
    %53 = vector.broadcast %52 : vector<1x128xf32> to vector<8x128xf32>
    %54 = arith.addf %51, %53 : vector<8x128xf32>
    %c0_30 = arith.constant 0 : index
    %c0_31 = arith.constant 0 : index
    %55 = vector.load %arg5[%c0_30, %c0_31] : memref<8x128xf32, #tpu.memory_space<vmem>>, vector<8x128xf32>
    tpu.vector_store %arg5[%c0_30, %c0_31], %54 {strides = array<i32>} : memref<8x128xf32, #tpu.memory_space<vmem>>, vector<8x128xf32>,
    return
  }
  func.func @transform_0(%arg0: i32) -> (i32, i32, i32) {
    %c0_i32 = arith.constant 0 : i32
    %c0_i32_0 = arith.constant 0 : i32
    %c0_i32_1 = arith.constant 0 : i32
    %c0_i32_2 = arith.constant 0 : i32
    return %c0_i32, %c0_i32_0, %c0_i32_1 : i32, i32, i32
  }
  func.func @transform_1(%arg0: i32) -> (i32, i32) {
    %c0_i32 = arith.constant 0 : i32
    %c0_i32_0 = arith.constant 0 : i32
    %c0_i32_1 = arith.constant 0 : i32
    return %c0_i32, %c0_i32_0 : i32, i32
  }
  func.func @transform_2(%arg0: i32) -> (i32, i32) {
    %c0_i32 = arith.constant 0 : i32
    %c0_i32_0 = arith.constant 0 : i32
    %c0_i32_1 = arith.constant 0 : i32
    return %c0_i32, %c0_i32_0 : i32, i32
  }
  func.func @transform_3(%arg0: i32) -> (i32, i32) {
    %c0_i32 = arith.constant 0 : i32
    %c0_i32_0 = arith.constant 0 : i32
    %c0_i32_1 = arith.constant 0 : i32
    return %c0_i32, %c0_i32_0 : i32, i32
  }
  func.func @transform_4(%arg0: i32) -> (i32, i32) {
    %c0_i32 = arith.constant 0 : i32
    %c0_i32_0 = arith.constant 0 : i32
    %c0_i32_1 = arith.constant 0 : i32
    return %c0_i32, %c0_i32_0 : i32, i32
  }
}

</mosaic_0001>

<bundles_post_ra>
// kernel: tpu_custom_call.1
= control target key start
LH: loop header
LB: loop body
LE: loop exit
PB: predicated region body
PF: predicated region fallthrough
CT: control target
= control target key end

     0   :  { %9 = vsyncpa [#allocation3], 0  ;;  %s1726_s0 = inlined_call_operand.hbm [shape: f32[8,8,128], index: 0, kind: input, shape index: {}]   ;;  %s1727_s1 = inlined_call_operand.hbm [shape: f32[128,128], index: 1, kind: input, shape index: {}]   ;;  %s1728_s2 = inlined_call_operand.hbm [shape: f32[128,128], index: 2, kind: input, shape index: {}]   ;;  %s1729_s3 = inlined_call_operand.vmem [shape: f32[1,128], index: 3, kind: input, shape index: {}]   ;;  %s1730_s4 = inlined_call_operand.hbm [shape: f32[8,128], index: 4, kind: output, shape index: {}]  }
   0x1   :  { %10 = vsyncpa [#allocation6], 0 }
   0x2   :  { %11 = vsyncpa [#allocation4], 0  ;;  %s1355_s15 = smov [#allocation5]   ;;  %s1356_s17 = smov [#allocation2]  }
   0x3   :  { %s29_s16 = sshll.u32 %s1355_s15, 4  ;;  %s17_s18 = sshll.u32 %s1356_s17, 4  ;;  %s30_s16 = int_to_ptr.vmem [resolvable:$true] %s29_s16  ;;  %s18_s18 = int_to_ptr.vmem [resolvable:$true] %s17_s18 }
   0x4   :  { %s1277_s19 = scalar_lea.vmem %s30_s16, 2048  ;;  %p1282_p1 = scmp.lt.s32.totalorder %s30_s16, %s30_s16 }
   0x5   :  { %p1278_p0 = scmp.ne.s32.totalorder %s30_s16, %s1277_s19  ;;  %p1283_p2 = scmp.lt.s32.totalorder %s1277_s19, %s1277_s19 }
   0x7   :  { %p1284_p3 = por %p1283_p2, %p1282_p1 }
   0x9   :  { %p1285_p4 = pnand %p1284_p3, %p1278_p0 }
   0xb   :  { %1288 = shalt.err (!%p1285_p4)
}
   0xc   :  { %s1357_s20 = smov 128   ;;  %s1358_s21 = smov 8  }
   0xd   :  { %35 = dma.hbm_to_vmem [thread:$0]  %s1727_s1, 2048, %s30_s16, [#allocation6], %s1357_s20, %s1357_s20, %s1358_s21  }
   0xe   :  { %s1297_s24 = scalar_lea.vmem %s18_s18, 1024  ;;  %p1302_p6 = scmp.lt.s32.totalorder %s18_s18, %s18_s18 }
   0xf   :  { %p1298_p5 = scmp.ne.s32.totalorder %s18_s18, %s1297_s24  ;;  %p1303_p7 = scmp.lt.s32.totalorder %s1297_s24, %s1297_s24 }
  0x11   :  { %p1304_p8 = por %p1303_p7, %p1302_p6 }
  0x13   :  { %p1305_p9 = pnand %p1304_p8, %p1298_p5 }
  0x15   :  { %1308 = shalt.err (!%p1305_p9)
}
  0x16   :  { %23 = dma.hbm_to_vmem [thread:$0]  %s1726_s0, 1024, %s18_s18, [#allocation3], %s1357_s20, %s1357_s20, %s1358_s21  }
  0x17   :  { %s1359_s27 = smov [#allocation7]  }
  0x18   :  { %s41_s28 = sshll.u32 %s1359_s27, 4  ;;  %s42_s28 = int_to_ptr.vmem [resolvable:$true] %s41_s28 }
  0x19   :  { %s1317_s29 = scalar_lea.vmem %s42_s28, 2048  ;;  %p1322_p11 = scmp.lt.s32.totalorder %s42_s28, %s42_s28 }
  0x1a   :  { %p1318_p10 = scmp.ne.s32.totalorder %s42_s28, %s1317_s29  ;;  %p1323_p12 = scmp.lt.s32.totalorder %s1317_s29, %s1317_s29 }
  0x1c   :  { %p1324_p13 = por %p1323_p12, %p1322_p11 }
  0x1e   :  { %p1325_p0 = pnand %p1324_p13, %p1318_p10 }
  0x20   :  { %1328 = shalt.err (!%p1325_p0)
}
  0x21   :  { %47 = dma.hbm_to_vmem [thread:$0]  %s1728_s2, 2048, %s42_s28, [#allocation6], %s1357_s20, %s1357_s20, %s1358_s21  }
  0x22   :  { %1349 = dma.done.wait [#allocation3], 1024  }
  0x23   :  { %1350 = vsyncadd [#allocation3], 4294966272 }
  0x24   :  { %1351 = dma.done.wait [#allocation6], 4096  }
  0x25   :  { %1352 = vsyncadd [#allocation6], 4294963200  ;;  %v1360_v0 = vmov 0.0   ;;  %vm1361_vm0 = vmmov 0   ;;  %v1403_v1 = vld [vmem:[#allocation5 + $0x78] sm:$0xff]  ;;  %v1405_v2 = vld [vmem:[#allocation5 + $0x70] sm:$0xff] }
  0x26   :  { %930 = vmatprep.subr.mxu0 %v1360_v0  ;;  %962 = vmatprep.mubr.msk.f32.mxu0 %vm1361_vm0, %v1360_v0  ;;  %v1410_v3 = vld [vmem:[#allocation5 + $0x68] sm:$0xff]  ;;  %v1416_v4 = vld [vmem:[#allocation5 + $0x60] sm:$0xff]  ;;  %v1422_v5 = vld [vmem:[#allocation5 + $0x58] sm:$0xff]  ;;  %s1362_s5 = smov [#allocation8]  }
  0x27   :  { %965 = vmatprep.subr.mxu1 %v1360_v0  ;;  %997 = vmatprep.mubr.msk.f32.mxu1 %vm1361_vm0, %v1360_v0  ;;  %v1428_v6 = vld [vmem:[#allocation5 + $0x50] sm:$0xff]  ;;  %v1434_v7 = vld [vmem:[#allocation5 + $0x48] sm:$0xff]  ;;  %v1440_v8 = vld [vmem:[#allocation5 + $0x40] sm:$0xff]  ;;  %s766_s6 = sshll.u32 %s1362_s5, 4  ;;  %s767_s6 = int_to_ptr.vmem [resolvable:$true] %s766_s6 }
  0x28   :  { %931 = vmatpush3.msra.mxu0 %v1403_v1  ;;  %966 = vmatpush3.msra.mxu1 %v1403_v1  ;;  %v1446_v9 = vld [vmem:[#allocation5 + $0x38] sm:$0xff]  ;;  %v1452_v10 = vld [vmem:[#allocation5 + $0x30] sm:$0xff]  ;;  %v1458_v11 = vld [vmem:[#allocation5 + $0x28] sm:$0xff]  ;;  %s1329_s7 = scalar_lea.vmem %s767_s6, 128  ;;  %p1334_p2 = scmp.lt.s32.totalorder %s767_s6, %s767_s6 }
  0x29   :  { %932 = vmatprep.subr.mxu0 %v1360_v0  ;;  %967 = vmatprep.subr.mxu1 %v1360_v0  ;;  %v1464_v12 = vld [vmem:[#allocation5 + $0x20] sm:$0xff]  ;;  %v1470_v13 = vld [vmem:[#allocation5 + $0x18] sm:$0xff]  ;;  %v1476_v14 = vld [vmem:[#allocation5 + $0x10] sm:$0xff]  ;;  %p1330_p1 = scmp.ne.s32.totalorder %s767_s6, %s1329_s7  ;;  %p1335_p3 = scmp.lt.s32.totalorder %s1329_s7, %s1329_s7 }
  0x2a   :  { %933 = vmatpush3.msra.mxu0 %v1405_v2  ;;  %968 = vmatpush3.msra.mxu1 %v1405_v2  ;;  %v1482_v15 = vld [vmem:[#allocation5 + $0x8] sm:$0xff]  ;;  %v1488_v16 = vld [vmem:[#allocation5] sm:$0xff]  ;;  %v223_v27 = vld [vmem:[#allocation2 + $0x10] sm:$0xff] }
  0x2b   :  { %934 = vmatprep.subr.mxu0 %v1360_v0  ;;  %969 = vmatprep.subr.mxu1 %v1360_v0  ;;  %v75_v17 = vld [vmem:[#allocation2] sm:$0xff]  ;;  %v149_v22 = vld [vmem:[#allocation2 + $0x8] sm:$0xff]  ;;  %v297_v32 = vld [vmem:[#allocation2 + $0x18] sm:$0xff]  ;;  %p1336_p4 = por %p1335_p3, %p1334_p2 }
  0x2c   :  { %935 = vmatpush3.msra.mxu0 %v1410_v3  ;;  %970 = vmatpush3.msra.mxu1 %v1410_v3  ;;  %v371_v37 = vld [vmem:[#allocation2 + $0x20] sm:$0xff]  ;;  %v445_v42 = vld [vmem:[#allocation2 + $0x28] sm:$0xff]  ;;  %v681_v47 = vld [vmem:[#allocation7 + $0x78] sm:$0xff] }
  0x2d   :  { %936 = vmatprep.subr.mxu0 %v1360_v0  ;;  %971 = vmatprep.subr.mxu1 %v1360_v0  ;;  %v680_v48 = vld [vmem:[#allocation7 + $0x70] sm:$0xff]  ;;  %v679_v49 = vld [vmem:[#allocation7 + $0x68] sm:$0xff]  ;;  %v678_v50 = vld [vmem:[#allocation7 + $0x60] sm:$0xff]  ;;  %p1337_p5 = pnand %p1336_p4, %p1330_p1 }
  0x2e   :  { %937 = vmatpush3.msra.mxu0 %v1416_v4  ;;  %972 = vmatpush3.msra.mxu1 %v1416_v4  ;;  %v677_v51 = vld [vmem:[#allocation7 + $0x58] sm:$0xff]  ;;  %v676_v52 = vld [vmem:[#allocation7 + $0x50] sm:$0xff]  ;;  %v675_v53 = vld [vmem:[#allocation7 + $0x48] sm:$0xff] }
  0x2f   :  { %938 = vmatprep.subr.mxu0 %v1360_v0  ;;  %973 = vmatprep.subr.mxu1 %v1360_v0  ;;  %v519_v54 = vld [vmem:[#allocation2 + $0x30] sm:$0xff]  ;;  %v674_v59 = vld [vmem:[#allocation7 + $0x40] sm:$0xff]  ;;  %v673_v60 = vld [vmem:[#allocation7 + $0x38] sm:$0xff] }
  0x30   :  { %939 = vmatpush3.msra.mxu0 %v1422_v5  ;;  %974 = vmatpush3.msra.mxu1 %v1422_v5  ;;  %v672_v61 = vld [vmem:[#allocation7 + $0x30] sm:$0xff]  ;;  %v671_v62 = vld [vmem:[#allocation7 + $0x28] sm:$0xff]  ;;  %v670_v63 = vld [vmem:[#allocation7 + $0x20] sm:$0xff] }
  0x31   :  { %940 = vmatprep.subr.mxu0 %v1360_v0  ;;  %975 = vmatprep.subr.mxu1 %v1360_v0 }
  0x32   :  { %941 = vmatpush3.msra.mxu0 %v1428_v6  ;;  %976 = vmatpush3.msra.mxu1 %v1428_v6 }
  0x33   :  { %942 = vmatprep.subr.mxu0 %v1360_v0  ;;  %977 = vmatprep.subr.mxu1 %v1360_v0 }
  0x34   :  { %943 = vmatpush3.msra.mxu0 %v1434_v7  ;;  %978 = vmatpush3.msra.mxu1 %v1434_v7 }
  0x35   :  { %944 = vmatprep.subr.mxu0 %v1360_v0  ;;  %979 = vmatprep.subr.mxu1 %v1360_v0 }
  0x36   :  { %945 = vmatpush3.msra.mxu0 %v1440_v8  ;;  %980 = vmatpush3.msra.mxu1 %v1440_v8 }
  0x37   :  { %946 = vmatprep.subr.mxu0 %v1360_v0  ;;  %981 = vmatprep.subr.mxu1 %v1360_v0 }
  0x38   :  { %947 = vmatpush3.msra.mxu0 %v1446_v9  ;;  %982 = vmatpush3.msra.mxu1 %v1446_v9 }
  0x39   :  { %948 = vmatprep.subr.mxu0 %v1360_v0  ;;  %983 = vmatprep.subr.mxu1 %v1360_v0 }
  0x3a   :  { %949 = vmatpush3.msra.mxu0 %v1452_v10  ;;  %984 = vmatpush3.msra.mxu1 %v1452_v10 }
  0x3b   :  { %950 = vmatprep.subr.mxu0 %v1360_v0  ;;  %985 = vmatprep.subr.mxu1 %v1360_v0 }
  0x3c   :  { %951 = vmatpush3.msra.mxu0 %v1458_v11  ;;  %986 = vmatpush3.msra.mxu1 %v1458_v11 }
  0x3d   :  { %952 = vmatprep.subr.mxu0 %v1360_v0  ;;  %987 = vmatprep.subr.mxu1 %v1360_v0 }
  0x3e   :  { %953 = vmatpush3.msra.mxu0 %v1464_v12  ;;  %988 = vmatpush3.msra.mxu1 %v1464_v12 }
  0x3f   :  { %954 = vmatprep.subr.mxu0 %v1360_v0  ;;  %989 = vmatprep.subr.mxu1 %v1360_v0 }
  0x40   :  { %955 = vmatpush3.msra.mxu0 %v1470_v13  ;;  %990 = vmatpush3.msra.mxu1 %v1470_v13 }
  0x41   :  { %956 = vmatprep.subr.mxu0 %v1360_v0  ;;  %991 = vmatprep.subr.mxu1 %v1360_v0 }
  0x42   :  { %957 = vmatpush3.msra.mxu0 %v1476_v14  ;;  %992 = vmatpush3.msra.mxu1 %v1476_v14 }
  0x43   :  { %958 = vmatprep.subr.mxu0 %v1360_v0  ;;  %993 = vmatprep.subr.mxu1 %v1360_v0 }
  0x44   :  { %959 = vmatpush3.msra.mxu0 %v1482_v15  ;;  %994 = vmatpush3.msra.mxu1 %v1482_v15 }
  0x45   :  { %960 = vmatprep.subr.mxu0 %v1360_v0  ;;  %995 = vmatprep.subr.mxu1 %v1360_v0 }
  0x46   :  { %961 = vmatpush3.msra.mxu0 %v1488_v16  ;;  %996 = vmatpush3.msra.mxu1 %v1488_v16 }
  0x47   :  { %963 = vmatmul.mubr.f32.vlgmr.msra.gmra.mxu0 %v1360_v0  ;;  %1000 = vmatprep.subr.mxu0 %v1360_v0 }
  0x48   :  { %1001 = vmatpush3.msra.mxu0 %v1403_v1  ;;  %1032 = vmatprep.mubr.msk.f32.mxu0 %vm1361_vm0, %v1360_v0 }
  0x49   :  { %1002 = vmatprep.subr.mxu0 %v1360_v0  ;;  %1035 = vmatprep.subr.mxu1 %v1360_v0 }
  0x4a   :  { %1003 = vmatpush3.msra.mxu0 %v1405_v2 }
  0x4b   :  { %1004 = vmatprep.subr.mxu0 %v1360_v0 }
  0x4c   :  { %1005 = vmatpush3.msra.mxu0 %v1410_v3 }
  0x4d   :  { %1006 = vmatprep.subr.mxu0 %v1360_v0 }
  0x4e   :  { %1007 = vmatpush3.msra.mxu0 %v1416_v4 }
  0x4f   :  { %1008 = vmatprep.subr.mxu0 %v1360_v0 }
  0x50   :  { %1009 = vmatpush3.msra.mxu0 %v1422_v5 }
  0x51   :  { %1010 = vmatprep.subr.mxu0 %v1360_v0 }
  0x52   :  { %1011 = vmatpush3.msra.mxu0 %v1428_v6 }
  0x53   :  { %1012 = vmatprep.subr.mxu0 %v1360_v0 }
  0x54   :  { %1013 = vmatpush3.msra.mxu0 %v1434_v7 }
  0x55   :  { %1014 = vmatprep.subr.mxu0 %v1360_v0 }
  0x56   :  { %1015 = vmatpush3.msra.mxu0 %v1440_v8 }
  0x57   :  { %1016 = vmatprep.subr.mxu0 %v1360_v0 }
  0x58   :  { %1017 = vmatpush3.msra.mxu0 %v1446_v9 }
  0x59   :  { %1018 = vmatprep.subr.mxu0 %v1360_v0 }
  0x5a   :  { %1019 = vmatpush3.msra.mxu0 %v1452_v10 }
  0x5b   :  { %1020 = vmatprep.subr.mxu0 %v1360_v0 }
  0x5c   :  { %1021 = vmatpush3.msra.mxu0 %v1458_v11 }
  0x5d   :  { %1022 = vmatprep.subr.mxu0 %v1360_v0 }
  0x5e   :  { %1023 = vmatpush3.msra.mxu0 %v1464_v12 }
  0x5f   :  { %1024 = vmatprep.subr.mxu0 %v1360_v0 }
  0x60   :  { %1025 = vmatpush3.msra.mxu0 %v1470_v13 }
  0x61   :  { %1026 = vmatprep.subr.mxu0 %v1360_v0 }
  0x62   :  { %1027 = vmatpush3.msra.mxu0 %v1476_v14 }
  0x63   :  { %1028 = vmatprep.subr.mxu0 %v1360_v0 }
  0x64   :  { %1029 = vmatpush3.msra.mxu0 %v1482_v15 }
  0x65   :  { %1030 = vmatprep.subr.mxu0 %v1360_v0 }
  0x66   :  { %1031 = vmatpush3.msra.mxu0 %v1488_v16 }
  0x67   :  { %1070 = vmatprep.subr.mxu0 %v1360_v0 }
 0x107   :  { %v142_v18 = vpop.f32.mrf.mxu0 }
 0x108   :  { %v146_v19 = vadd.f32 %v142_v18, %v75_v17 }
 0x109   :  { %v964_v20 = vpop.f32.mrf.mxu0 }
 0x10a   :  { %1253 = vtanh.f32 %v146_v19 }
 0x117   :  { %v1254_v21 = vpop.eup %1253 }
 0x118   :  { %998 = vmatmul.mubr.f32.vlgmr.msra.gmra.mxu1 %v1254_v21 }
 0x119   :  { %1036 = vmatpush3.msra.mxu1 %v1403_v1  ;;  %1067 = vmatprep.mubr.msk.f32.mxu1 %vm1361_vm0, %v1360_v0 }
 0x11a   :  { %1037 = vmatprep.subr.mxu1 %v1360_v0 }
 0x11b   :  { %1038 = vmatpush3.msra.mxu1 %v1405_v2 }
 0x11c   :  { %1039 = vmatprep.subr.mxu1 %v1360_v0 }
 0x11d   :  { %1040 = vmatpush3.msra.mxu1 %v1410_v3 }
 0x11e   :  { %1041 = vmatprep.subr.mxu1 %v1360_v0 }
 0x11f   :  { %1042 = vmatpush3.msra.mxu1 %v1416_v4 }
 0x120   :  { %1043 = vmatprep.subr.mxu1 %v1360_v0 }
 0x121   :  { %1044 = vmatpush3.msra.mxu1 %v1422_v5 }
 0x122   :  { %1045 = vmatprep.subr.mxu1 %v1360_v0 }
 0x123   :  { %1046 = vmatpush3.msra.mxu1 %v1428_v6 }
 0x124   :  { %1047 = vmatprep.subr.mxu1 %v1360_v0 }
 0x125   :  { %1048 = vmatpush3.msra.mxu1 %v1434_v7 }
 0x126   :  { %1049 = vmatprep.subr.mxu1 %v1360_v0 }
 0x127   :  { %1050 = vmatpush3.msra.mxu1 %v1440_v8 }
 0x128   :  { %1051 = vmatprep.subr.mxu1 %v1360_v0 }
 0x129   :  { %1052 = vmatpush3.msra.mxu1 %v1446_v9 }
 0x12a   :  { %1053 = vmatprep.subr.mxu1 %v1360_v0 }
 0x12b   :  { %1054 = vmatpush3.msra.mxu1 %v1452_v10 }
 0x12c   :  { %1055 = vmatprep.subr.mxu1 %v1360_v0 }
 0x12d   :  { %1056 = vmatpush3.msra.mxu1 %v1458_v11 }
 0x12e   :  { %1057 = vmatprep.subr.mxu1 %v1360_v0 }
 0x12f   :  { %1058 = vmatpush3.msra.mxu1 %v1464_v12 }
 0x130   :  { %1059 = vmatprep.subr.mxu1 %v1360_v0 }
 0x131   :  { %1060 = vmatpush3.msra.mxu1 %v1470_v13 }
 0x132   :  { %1061 = vmatprep.subr.mxu1 %v1360_v0 }
 0x133   :  { %1062 = vmatpush3.msra.mxu1 %v1476_v14 }
 0x134   :  { %1063 = vmatprep.subr.mxu1 %v1360_v0 }
 0x135   :  { %1064 = vmatpush3.msra.mxu1 %v1482_v15 }
 0x136   :  { %1065 = vmatprep.subr.mxu1 %v1360_v0 }
 0x137   :  { %1066 = vmatpush3.msra.mxu1 %v1488_v16 }
 0x138   :  { %1105 = vmatprep.subr.mxu1 %v1360_v0 }
 0x1d8   :  { %v216_v23 = vpop.f32.mrf.mxu1 }
 0x1d9   :  { %v220_v24 = vadd.f32 %v216_v23, %v149_v22 }
 0x1da   :  { %v999_v25 = vpop.f32.mrf.mxu1 }
 0x1db   :  { %1255 = vtanh.f32 %v220_v24 }
 0x1e8   :  { %v1256_v26 = vpop.eup %1255 }
 0x1e9   :  { %1033 = vmatmul.mubr.f32.vlgmr.msra.gmra.mxu0 %v1256_v26 }
 0x1ea   :  { %1071 = vmatpush3.msra.mxu0 %v1403_v1  ;;  %1102 = vmatprep.mubr.msk.f32.mxu0 %vm1361_vm0, %v1360_v0 }
 0x1eb   :  { %1072 = vmatprep.subr.mxu0 %v1360_v0 }
 0x1ec   :  { %1073 = vmatpush3.msra.mxu0 %v1405_v2 }
 0x1ed   :  { %1074 = vmatprep.subr.mxu0 %v1360_v0 }
 0x1ee   :  { %1075 = vmatpush3.msra.mxu0 %v1410_v3 }
 0x1ef   :  { %1076 = vmatprep.subr.mxu0 %v1360_v0 }
 0x1f0   :  { %1077 = vmatpush3.msra.mxu0 %v1416_v4 }
 0x1f1   :  { %1078 = vmatprep.subr.mxu0 %v1360_v0 }
 0x1f2   :  { %1079 = vmatpush3.msra.mxu0 %v1422_v5 }
 0x1f3   :  { %1080 = vmatprep.subr.mxu0 %v1360_v0 }
 0x1f4   :  { %1081 = vmatpush3.msra.mxu0 %v1428_v6 }
 0x1f5   :  { %1082 = vmatprep.subr.mxu0 %v1360_v0 }
 0x1f6   :  { %1083 = vmatpush3.msra.mxu0 %v1434_v7 }
 0x1f7   :  { %1084 = vmatprep.subr.mxu0 %v1360_v0 }
 0x1f8   :  { %1085 = vmatpush3.msra.mxu0 %v1440_v8 }
 0x1f9   :  { %1086 = vmatprep.subr.mxu0 %v1360_v0 }
 0x1fa   :  { %1087 = vmatpush3.msra.mxu0 %v1446_v9 }
 0x1fb   :  { %1088 = vmatprep.subr.mxu0 %v1360_v0 }
 0x1fc   :  { %1089 = vmatpush3.msra.mxu0 %v1452_v10 }
 0x1fd   :  { %1090 = vmatprep.subr.mxu0 %v1360_v0 }
 0x1fe   :  { %1091 = vmatpush3.msra.mxu0 %v1458_v11 }
 0x1ff   :  { %1092 = vmatprep.subr.mxu0 %v1360_v0 }
 0x200   :  { %1093 = vmatpush3.msra.mxu0 %v1464_v12 }
 0x201   :  { %1094 = vmatprep.subr.mxu0 %v1360_v0 }
 0x202   :  { %1095 = vmatpush3.msra.mxu0 %v1470_v13 }
 0x203   :  { %1096 = vmatprep.subr.mxu0 %v1360_v0 }
 0x204   :  { %1097 = vmatpush3.msra.mxu0 %v1476_v14 }
 0x205   :  { %1098 = vmatprep.subr.mxu0 %v1360_v0 }
 0x206   :  { %1099 = vmatpush3.msra.mxu0 %v1482_v15 }
 0x207   :  { %1100 = vmatprep.subr.mxu0 %v1360_v0 }
 0x208   :  { %1101 = vmatpush3.msra.mxu0 %v1488_v16 }
 0x209   :  { %1140 = vmatprep.subr.mxu0 %v1360_v0 }
 0x2a9   :  { %v290_v28 = vpop.f32.mrf.mxu0 }
 0x2aa   :  { %v294_v29 = vadd.f32 %v290_v28, %v223_v27 }
 0x2ab   :  { %v1034_v30 = vpop.f32.mrf.mxu0 }
 0x2ac   :  { %1257 = vtanh.f32 %v294_v29 }
 0x2b9   :  { %v1258_v31 = vpop.eup %1257 }
 0x2ba   :  { %1068 = vmatmul.mubr.f32.vlgmr.msra.gmra.mxu1 %v1258_v31 }
 0x2bb   :  { %1106 = vmatpush3.msra.mxu1 %v1403_v1  ;;  %1137 = vmatprep.mubr.msk.f32.mxu1 %vm1361_vm0, %v1360_v0 }
 0x2bc   :  { %1107 = vmatprep.subr.mxu1 %v1360_v0 }
 0x2bd   :  { %1108 = vmatpush3.msra.mxu1 %v1405_v2 }
 0x2be   :  { %1109 = vmatprep.subr.mxu1 %v1360_v0 }
 0x2bf   :  { %1110 = vmatpush3.msra.mxu1 %v1410_v3 }
 0x2c0   :  { %1111 = vmatprep.subr.mxu1 %v1360_v0 }
 0x2c1   :  { %1112 = vmatpush3.msra.mxu1 %v1416_v4 }
 0x2c2   :  { %1113 = vmatprep.subr.mxu1 %v1360_v0 }
 0x2c3   :  { %1114 = vmatpush3.msra.mxu1 %v1422_v5 }
 0x2c4   :  { %1115 = vmatprep.subr.mxu1 %v1360_v0 }
 0x2c5   :  { %1116 = vmatpush3.msra.mxu1 %v1428_v6 }
 0x2c6   :  { %1117 = vmatprep.subr.mxu1 %v1360_v0 }
 0x2c7   :  { %1118 = vmatpush3.msra.mxu1 %v1434_v7 }
 0x2c8   :  { %1119 = vmatprep.subr.mxu1 %v1360_v0 }
 0x2c9   :  { %1120 = vmatpush3.msra.mxu1 %v1440_v8 }
 0x2ca   :  { %1121 = vmatprep.subr.mxu1 %v1360_v0 }
 0x2cb   :  { %1122 = vmatpush3.msra.mxu1 %v1446_v9 }
 0x2cc   :  { %1123 = vmatprep.subr.mxu1 %v1360_v0 }
 0x2cd   :  { %1124 = vmatpush3.msra.mxu1 %v1452_v10 }
 0x2ce   :  { %1125 = vmatprep.subr.mxu1 %v1360_v0 }
 0x2cf   :  { %1126 = vmatpush3.msra.mxu1 %v1458_v11 }
 0x2d0   :  { %1127 = vmatprep.subr.mxu1 %v1360_v0 }
 0x2d1   :  { %1128 = vmatpush3.msra.mxu1 %v1464_v12 }
 0x2d2   :  { %1129 = vmatprep.subr.mxu1 %v1360_v0 }
 0x2d3   :  { %1130 = vmatpush3.msra.mxu1 %v1470_v13 }
 0x2d4   :  { %1131 = vmatprep.subr.mxu1 %v1360_v0 }
 0x2d5   :  { %1132 = vmatpush3.msra.mxu1 %v1476_v14 }
 0x2d6   :  { %1133 = vmatprep.subr.mxu1 %v1360_v0 }
 0x2d7   :  { %1134 = vmatpush3.msra.mxu1 %v1482_v15 }
 0x2d8   :  { %1135 = vmatprep.subr.mxu1 %v1360_v0 }
 0x2d9   :  { %1136 = vmatpush3.msra.mxu1 %v1488_v16 }
 0x2da   :  { %1175 = vmatprep.subr.mxu1 %v1360_v0 }
 0x37a   :  { %v364_v33 = vpop.f32.mrf.mxu1 }
 0x37b   :  { %v368_v34 = vadd.f32 %v364_v33, %v297_v32 }
 0x37c   :  { %v1069_v35 = vpop.f32.mrf.mxu1 }
 0x37d   :  { %1259 = vtanh.f32 %v368_v34 }
 0x38a   :  { %v1260_v36 = vpop.eup %1259 }
 0x38b   :  { %1103 = vmatmul.mubr.f32.vlgmr.msra.gmra.mxu0 %v1260_v36 }
 0x38c   :  { %1141 = vmatpush3.msra.mxu0 %v1403_v1  ;;  %1172 = vmatprep.mubr.msk.f32.mxu0 %vm1361_vm0, %v1360_v0 }
 0x38d   :  { %1142 = vmatprep.subr.mxu0 %v1360_v0 }
 0x38e   :  { %1143 = vmatpush3.msra.mxu0 %v1405_v2 }
 0x38f   :  { %1144 = vmatprep.subr.mxu0 %v1360_v0 }
 0x390   :  { %1145 = vmatpush3.msra.mxu0 %v1410_v3 }
 0x391   :  { %1146 = vmatprep.subr.mxu0 %v1360_v0 }
 0x392   :  { %1147 = vmatpush3.msra.mxu0 %v1416_v4 }
 0x393   :  { %1148 = vmatprep.subr.mxu0 %v1360_v0 }
 0x394   :  { %1149 = vmatpush3.msra.mxu0 %v1422_v5 }
 0x395   :  { %1150 = vmatprep.subr.mxu0 %v1360_v0 }
 0x396   :  { %1151 = vmatpush3.msra.mxu0 %v1428_v6 }
 0x397   :  { %1152 = vmatprep.subr.mxu0 %v1360_v0 }
 0x398   :  { %1153 = vmatpush3.msra.mxu0 %v1434_v7 }
 0x399   :  { %1154 = vmatprep.subr.mxu0 %v1360_v0 }
 0x39a   :  { %1155 = vmatpush3.msra.mxu0 %v1440_v8 }
 0x39b   :  { %1156 = vmatprep.subr.mxu0 %v1360_v0 }
 0x39c   :  { %1157 = vmatpush3.msra.mxu0 %v1446_v9 }
 0x39d   :  { %1158 = vmatprep.subr.mxu0 %v1360_v0 }
 0x39e   :  { %1159 = vmatpush3.msra.mxu0 %v1452_v10 }
 0x39f   :  { %1160 = vmatprep.subr.mxu0 %v1360_v0 }
 0x3a0   :  { %1161 = vmatpush3.msra.mxu0 %v1458_v11 }
 0x3a1   :  { %1162 = vmatprep.subr.mxu0 %v1360_v0 }
 0x3a2   :  { %1163 = vmatpush3.msra.mxu0 %v1464_v12 }
 0x3a3   :  { %1164 = vmatprep.subr.mxu0 %v1360_v0 }
 0x3a4   :  { %1165 = vmatpush3.msra.mxu0 %v1470_v13 }
 0x3a5   :  { %1166 = vmatprep.subr.mxu0 %v1360_v0 }
 0x3a6   :  { %1167 = vmatpush3.msra.mxu0 %v1476_v14 }
 0x3a7   :  { %1168 = vmatprep.subr.mxu0 %v1360_v0 }
 0x3a8   :  { %1169 = vmatpush3.msra.mxu0 %v1482_v15 }
 0x3a9   :  { %1170 = vmatprep.subr.mxu0 %v1360_v0 }
 0x3aa   :  { %1171 = vmatpush3.msra.mxu0 %v1488_v16 }
 0x3ab   :  { %1210 = vmatprep.subr.mxu0 %v1360_v0 }
 0x44b   :  { %v438_v38 = vpop.f32.mrf.mxu0 }
 0x44c   :  { %v442_v39 = vadd.f32 %v438_v38, %v371_v37 }
 0x44d   :  { %v1104_v40 = vpop.f32.mrf.mxu0 }
 0x44e   :  { %1261 = vtanh.f32 %v442_v39 }
 0x45b   :  { %v1262_v41 = vpop.eup %1261 }
 0x45c   :  { %1138 = vmatmul.mubr.f32.vlgmr.msra.gmra.mxu1 %v1262_v41 }
 0x45d   :  { %1176 = vmatpush3.msra.mxu1 %v1403_v1  ;;  %1207 = vmatprep.mubr.msk.f32.mxu1 %vm1361_vm0, %v1360_v0  ;;  %v669_v1 = vld [vmem:[#allocation7 + $0x18] sm:$0xff] }
 0x45e   :  { %1177 = vmatprep.subr.mxu1 %v1360_v0 }
 0x45f   :  { %1178 = vmatpush3.msra.mxu1 %v1405_v2  ;;  %v668_v2 = vld [vmem:[#allocation7 + $0x10] sm:$0xff] }
 0x460   :  { %1179 = vmatprep.subr.mxu1 %v1360_v0 }
 0x461   :  { %1180 = vmatpush3.msra.mxu1 %v1410_v3  ;;  %v667_v3 = vld [vmem:[#allocation7 + $0x8] sm:$0xff] }
 0x462   :  { %1181 = vmatprep.subr.mxu1 %v1360_v0 }
 0x463   :  { %1182 = vmatpush3.msra.mxu1 %v1416_v4  ;;  %v666_v4 = vld [vmem:[#allocation7] sm:$0xff] }
 0x464   :  { %1183 = vmatprep.subr.mxu1 %v1360_v0 }
 0x465   :  { %1184 = vmatpush3.msra.mxu1 %v1422_v5  ;;  %v593_v5 = vld [vmem:[#allocation2 + $0x38] sm:$0xff] }
 0x466   :  { %1185 = vmatprep.subr.mxu1 %v1360_v0 }
 0x467   :  { %1186 = vmatpush3.msra.mxu1 %v1428_v6 }
 0x468   :  { %1187 = vmatprep.subr.mxu1 %v1360_v0 }
 0x469   :  { %1188 = vmatpush3.msra.mxu1 %v1434_v7 }
 0x46a   :  { %1189 = vmatprep.subr.mxu1 %v1360_v0 }
 0x46b   :  { %1190 = vmatpush3.msra.mxu1 %v1440_v8 }
 0x46c   :  { %1191 = vmatprep.subr.mxu1 %v1360_v0 }
 0x46d   :  { %1192 = vmatpush3.msra.mxu1 %v1446_v9 }
 0x46e   :  { %1193 = vmatprep.subr.mxu1 %v1360_v0 }
 0x46f   :  { %1194 = vmatpush3.msra.mxu1 %v1452_v10  ;;  %v776_v10 = vld [vmem:[%s1729_s3] ss:$0 sm:$0xff] }
 0x470   :  { %1195 = vmatprep.subr.mxu1 %v1360_v0 }
 0x471   :  { %1196 = vmatpush3.msra.mxu1 %v1458_v11 }
 0x472   :  { %1197 = vmatprep.subr.mxu1 %v1360_v0 }
 0x473   :  { %1198 = vmatpush3.msra.mxu1 %v1464_v12 }
 0x474   :  { %1199 = vmatprep.subr.mxu1 %v1360_v0 }
 0x475   :  { %1200 = vmatpush3.msra.mxu1 %v1470_v13 }
 0x476   :  { %1201 = vmatprep.subr.mxu1 %v1360_v0 }
 0x477   :  { %1202 = vmatpush3.msra.mxu1 %v1476_v14 }
 0x478   :  { %1203 = vmatprep.subr.mxu1 %v1360_v0 }
 0x479   :  { %1204 = vmatpush3.msra.mxu1 %v1482_v15 }
 0x47a   :  { %1205 = vmatprep.subr.mxu1 %v1360_v0 }
 0x47b   :  { %1206 = vmatpush3.msra.mxu1 %v1488_v16 }
 0x51c   :  { %v512_v43 = vpop.f32.mrf.mxu1 }
 0x51d   :  { %v516_v44 = vadd.f32 %v512_v43, %v445_v42 }
 0x51e   :  { %v1139_v45 = vpop.f32.mrf.mxu1 }
 0x51f   :  { %1263 = vtanh.f32 %v516_v44 }
 0x52c   :  { %v1264_v46 = vpop.eup %1263 }
 0x52d   :  { %1173 = vmatmul.mubr.f32.vlgmr.msra.gmra.mxu0 %v1264_v46 }
 0x52e   :  { %1242 = vmatprep.mubr.msk.f32.mxu0 %vm1361_vm0, %v1360_v0  ;;  %1211 = vmatpush3.msra.mxu0 %v681_v47 }
 0x52f   :  { %1212 = vmatprep.subr.mxu0 %v1360_v0 }
 0x530   :  { %1213 = vmatpush3.msra.mxu0 %v680_v48 }
 0x531   :  { %1214 = vmatprep.subr.mxu0 %v1360_v0 }
 0x532   :  { %1215 = vmatpush3.msra.mxu0 %v679_v49 }
 0x533   :  { %1216 = vmatprep.subr.mxu0 %v1360_v0 }
 0x534   :  { %1217 = vmatpush3.msra.mxu0 %v678_v50 }
 0x535   :  { %1218 = vmatprep.subr.mxu0 %v1360_v0 }
 0x536   :  { %1219 = vmatpush3.msra.mxu0 %v677_v51 }
 0x537   :  { %1220 = vmatprep.subr.mxu0 %v1360_v0 }
 0x538   :  { %1221 = vmatpush3.msra.mxu0 %v676_v52 }
 0x539   :  { %1222 = vmatprep.subr.mxu0 %v1360_v0 }
 0x53a   :  { %1223 = vmatpush3.msra.mxu0 %v675_v53 }
 0x53b   :  { %1224 = vmatprep.subr.mxu0 %v1360_v0 }
 0x53c   :  { %1225 = vmatpush3.msra.mxu0 %v674_v59 }
 0x53d   :  { %1226 = vmatprep.subr.mxu0 %v1360_v0 }
 0x53e   :  { %1227 = vmatpush3.msra.mxu0 %v673_v60 }
 0x53f   :  { %1228 = vmatprep.subr.mxu0 %v1360_v0 }
 0x540   :  { %1229 = vmatpush3.msra.mxu0 %v672_v61 }
 0x541   :  { %1230 = vmatprep.subr.mxu0 %v1360_v0 }
 0x542   :  { %1231 = vmatpush3.msra.mxu0 %v671_v62 }
 0x543   :  { %1232 = vmatprep.subr.mxu0 %v1360_v0 }
 0x544   :  { %1233 = vmatpush3.msra.mxu0 %v670_v63 }
 0x545   :  { %1234 = vmatprep.subr.mxu0 %v1360_v0 }
 0x546   :  { %1235 = vmatpush3.msra.mxu0 %v669_v1 }
 0x547   :  { %1236 = vmatprep.subr.mxu0 %v1360_v0 }
 0x548   :  { %1237 = vmatpush3.msra.mxu0 %v668_v2 }
 0x549   :  { %1238 = vmatprep.subr.mxu0 %v1360_v0 }
 0x54a   :  { %1239 = vmatpush3.msra.mxu0 %v667_v3 }
 0x54b   :  { %1240 = vmatprep.subr.mxu0 %v1360_v0 }
 0x54c   :  { %1241 = vmatpush3.msra.mxu0 %v666_v4 }
 0x5ed   :  { %v586_v55 = vpop.f32.mrf.mxu0 }
 0x5ee   :  { %v590_v56 = vadd.f32 %v586_v55, %v519_v54 }
 0x5ef   :  { %v1174_v57 = vpop.f32.mrf.mxu0 }
 0x5f0   :  { %1265 = vtanh.f32 %v590_v56 }
 0x5fd   :  { %v1266_v58 = vpop.eup %1265 }
 0x5fe   :  { %1208 = vmatmul.mubr.f32.vlgmr.msra.gmra.mxu1 %v1266_v58 }
 0x6be   :  { %v660_v6 = vpop.f32.mrf.mxu1 }
 0x6bf   :  { %v664_v7 = vadd.f32 %v660_v6, %v593_v5 }
 0x6c0   :  { %v1209_v8 = vpop.f32.mrf.mxu1 }
 0x6c1   :  { %1267 = vtanh.f32 %v664_v7 }
 0x6ce   :  { %v1268_v9 = vpop.eup %1267 }
 0x6cf   :  { %1243 = vmatmul.mubr.f32.vlgmr.msra.gmra.mxu0 %v1268_v9 }
 0x78f   :  { %v755_v11 = vpop.f32.mrf.mxu0 }
 0x790   :  { %v756_v12 = vadd.f32 %v776_v10, %v755_v11 }
 0x791   :  { %v1244_v13 = vpop.f32.mrf.mxu0 }
 0x792   :  { %759 = vst [vmem:[#allocation8] sm:$0xff] %v756_v12 }
 0x793   :  { %1340 = shalt.err (!%p1337_p5)
}
 0x794   :  { %769 = dma.vmem_to_hbm [thread:$0]  %s767_s6, 128, %s1730_s4, [#allocation4]  }
 0x795   :  { %1353 = dma.done.wait [#allocation4], 128  }
 0x796   :  { %1354 = vsyncadd [#allocation4], 4294967168 }
 0x797   :  { %773 = vsyncpa [#allocation3], 1 }
 0x798   :  { %774 = vsyncpa [#allocation6], 1 }
 0x799   :  { %775 = vsyncpa [#allocation4], 1 }

</bundles_post_ra>
